<compile_context>
chip_gen: v7x
topology: tpu7x:2x2x1
jax: 0.10.0
libtpu: 0.0.40
codegen_flags: <defaults>
</compile_context>

<pallas_src>
import functools
import math

import jax
import jax.numpy as jnp
from jax.experimental import pallas as pl
from jax.experimental.pallas import tpu as pltpu


def _rmsnorm_kernel(x_ref, scale_ref, o_ref, *, dim, eps):
    # x_ref: (tile, dim), scale_ref: (1, dim), o_ref: (tile, dim)
    x = x_ref[...].astype(jnp.float32)
    # Row-wise sum of squares; Mosaic masks lanes beyond the logical dim.
    ssq = jnp.sum(x * x, axis=-1, keepdims=True)            # (tile, 1)
    rms = jnp.sqrt(ssq) * (dim ** -0.5)
    # eps added AFTER the sqrt, matching the PyTorch module exactly.
    inv = pl.reciprocal(rms + eps, approx=False)             # EUP slot, exact
    scale = scale_ref[...].astype(jnp.float32)                # (1, dim)
    o_ref[...] = (x * (inv * scale)).astype(o_ref.dtype)


def _hw_info():
    """(vmem_capacity_bytes, num_tensorcores) with safe fallbacks."""
    cap = 64 << 20   # conservative default (v7x per-TC VMEM)
    cores = 1
    try:
        info = pltpu.get_tpu_info()
        cap = int(getattr(info, "vmem_capacity_bytes", cap))
        for attr in ("num_cores", "core_count", "tensorcore_count"):
            v = getattr(info, attr, None)
            if isinstance(v, int) and v > 0:
                cores = v
                break
        else:
            # Heuristic: 64 MiB per-core VMEM => v7x-class part with 2 TCs/chip.
            cores = 2 if cap <= (64 << 20) else 1
    except Exception:
        pass
    return cap, cores


def _vmem_budgets(vmem_capacity_bytes):
    """(block_budget_bytes, vmem_limit_bytes) per generation."""
    if vmem_capacity_bytes <= (64 << 20):       # v7x: 64 MiB physical
        return 20 << 20, 38 << 20
    return 56 << 20, 96 << 20                   # v5e / v6e: 128 MiB physical


def _sublane_pack(dtype_bytes):
    # Native packed-tile rows: f32 -> 8, bf16 -> 16, int8/fp8 -> 32.
    return 8 * max(1, 4 // max(dtype_bytes, 1))


def _choose_row_tile(rows, dim, dtype_bytes, *, budget_bytes, num_cores):
    """Pick a row tile from the VMEM budget (double-buffered in/out + f32 temps)."""
    if rows <= 8:
        return rows
    pack = _sublane_pack(dtype_bytes)
    # Per-row VMEM: 2x input + 2x output blocks (native dtype, double-buffered)
    # plus ~4 full-tile f32 temporaries in the body (upcast, square, product, out).
    per_row = dim * (4 * dtype_bytes + 4 * 4)
    tile = min(rows, max(8, budget_bytes // max(per_row, 1)))
    if tile >= pack:
        tile -= tile % pack
    else:
        tile = max(8, tile - tile % 8)
    # Only force multiple grid steps when 2 TensorCores can actually share them.
    if num_cores >= 2:
        while tile > 8 and pl.cdiv(rows, tile) < num_cores:
            half = (tile // 2) - ((tile // 2) % 8)
            tile = max(8, half)
    return tile


def rmsnorm(x, scale, eps=1e-8, *, row_tile=None):
    """x: (..., dim), scale: (dim,). Returns same shape/dtype as x."""
    orig_shape = x.shape
    dim = orig_shape[-1]
    rows = math.prod(orig_shape[:-1]) if len(orig_shape) > 1 else 1

    x2d = x.reshape(rows, dim)
    scale2d = scale.reshape(1, dim)

    vmem_cap, num_cores = _hw_info()
    block_budget, vmem_limit = _vmem_budgets(vmem_cap)

    dtype_bytes = jnp.dtype(x.dtype).itemsize
    tile = row_tile if row_tile is not None else _choose_row_tile(
        rows, dim, dtype_bytes, budget_bytes=block_budget, num_cores=num_cores)
    grid = (pl.cdiv(rows, tile),)

    # TODO(synk): add a feature-dim chunked (two-pass) path for dims so large that
    # even an 8-row block overflows the v7x VMEM budget.

    kernel = functools.partial(_rmsnorm_kernel, dim=dim, eps=eps)

    cost = pl.CostEstimate(
        flops=3 * rows * dim,                     # square + reduce + scale*mul (approx)
        transcendentals=2 * rows,                 # sqrt + reciprocal per row
        bytes_accessed=2 * rows * dim * dtype_bytes + dim * dtype_bytes,
    )

    out2d = pl.pallas_call(
        kernel,
        out_shape=jax.ShapeDtypeStruct((rows, dim), x.dtype),
        grid_spec=pltpu.PrefetchScalarGridSpec(
            num_scalar_prefetch=0,
            grid=grid,
            in_specs=[
                pl.BlockSpec((tile, dim), lambda i: (i, 0)),
                pl.BlockSpec((1, dim), lambda i: (0, 0)),   # scale stays resident
            ],
            out_specs=pl.BlockSpec((tile, dim), lambda i: (i, 0)),
        ),
        compiler_params=pltpu.CompilerParams(
            dimension_semantics=("parallel",),
            vmem_limit_bytes=vmem_limit,
        ),
        cost_estimate=cost,
    )(x2d, scale2d)

    return out2d.reshape(orig_shape)


def rmsnorm_ref(x, scale, dim, eps=1e-8):
    # Pure-JAX reference mirroring the PyTorch forward exactly.
    norm_x = jnp.linalg.norm(x, ord=2, axis=-1, keepdims=True)
    rms_x = norm_x * (dim ** -0.5)
    x_normed = x / (rms_x + eps)
    return scale * x_normed


if __name__ == "__main__":
    batch, seq, hidden = 2, 8, 32
    eps = 1e-8

    key = jax.random.PRNGKey(0)
    x = jax.random.normal(key, (batch, seq, hidden), dtype=jnp.float32)
    # Deterministic parameter init mirroring torch.ones(dim).
    scale = jnp.ones((hidden,), dtype=jnp.float32)

    out = rmsnorm(x, scale, eps=eps)
    out = jax.block_until_ready(out)

    ref = rmsnorm_ref(x, scale, hidden, eps=eps)
    assert out.shape == x.shape and out.dtype == x.dtype
    assert jnp.allclose(out, ref, atol=1e-5, rtol=1e-5), "mismatch vs reference"

    print("KERNEL_OK")
</pallas_src>

<mosaic_0001>
module attributes {stable_mosaic.version = 11 : i64} {
  func.func @_rmsnorm_kernel(%arg0: i32, %arg1: memref<16x32xf32, #tpu.memory_space<vmem>>, %arg2: memref<1x32xf32, #tpu.memory_space<vmem>>, %arg3: memref<16x32xf32, #tpu.memory_space<vmem>>) attributes {dimension_semantics = [#tpu.dimension_semantics<parallel>], iteration_bounds = array<i64: 1>, scalar_prefetch = 0 : i64, scratch_operands = 0 : i64, tpu.core_type = #tpu.core_type<tc>, window_params = [{transform_indices = @transform_0, window_bounds = array<i64: 16, 32>}, {pipeline_mode = #tpu.pipeline_mode<synchronous>, transform_indices = @transform_1, window_bounds = array<i64: 1, 32>}, {transform_indices = @transform_2, window_bounds = array<i64: 16, 32>}]} {
    %c0 = arith.constant 0 : index
    %c0_0 = arith.constant 0 : index
    %0 = vector.load %arg1[%c0, %c0_0] : memref<16x32xf32, #tpu.memory_space<vmem>>, vector<16x32xf32>
    %1 = arith.mulf %0, %0 : vector<16x32xf32>
    %cst = arith.constant dense<0.000000e+00> : vector<16xf32>
    %2 = vector.multi_reduction <add>, %1, %cst [1] : vector<16x32xf32> to vector<16xf32>
    %3 = vector.shape_cast %2 : vector<16xf32> to vector<16x1xf32>
    %4 = math.sqrt %3 : vector<16x1xf32>
    %cst_1 = arith.constant 0.176776692 : f32
    %5 = vector.broadcast %cst_1 : f32 to vector<16x1xf32>
    %6 = arith.mulf %4, %5 : vector<16x1xf32>
    %cst_2 = arith.constant 9.99999993E-9 : f32
    %7 = vector.broadcast %cst_2 : f32 to vector<16x1xf32>
    %8 = arith.addf %6, %7 : vector<16x1xf32>
    %9 = tpu.reciprocal %8 : vector<16x1xf32> -> vector<16x1xf32>
    %c0_3 = arith.constant 0 : index
    %c0_4 = arith.constant 0 : index
    %10 = vector.load %arg2[%c0_3, %c0_4] : memref<1x32xf32, #tpu.memory_space<vmem>>, vector<1x32xf32>
    %11 = vector.broadcast %9 : vector<16x1xf32> to vector<16x32xf32>
    %12 = vector.broadcast %10 : vector<1x32xf32> to vector<16x32xf32>
    %13 = arith.mulf %11, %12 : vector<16x32xf32>
    %14 = arith.mulf %0, %13 : vector<16x32xf32>
    %c0_5 = arith.constant 0 : index
    %c0_6 = arith.constant 0 : index
    %15 = vector.load %arg3[%c0_5, %c0_6] : memref<16x32xf32, #tpu.memory_space<vmem>>, vector<16x32xf32>
    tpu.vector_store %arg3[%c0_5, %c0_6], %14 {strides = array<i32>} : memref<16x32xf32, #tpu.memory_space<vmem>>, vector<16x32xf32>,
    return
  }
  func.func @transform_0(%arg0: i32) -> (i32, i32) {
    %c0_i32 = arith.constant 0 : i32
    %c0_i32_0 = arith.constant 0 : i32
    return %arg0, %c0_i32 : i32, i32
  }
  func.func @transform_1(%arg0: i32) -> (i32, i32) {
    %c0_i32 = arith.constant 0 : i32
    %c0_i32_0 = arith.constant 0 : i32
    %c0_i32_1 = arith.constant 0 : i32
    return %c0_i32, %c0_i32_0 : i32, i32
  }
  func.func @transform_2(%arg0: i32) -> (i32, i32) {
    %c0_i32 = arith.constant 0 : i32
    %c0_i32_0 = arith.constant 0 : i32
    return %arg0, %c0_i32 : i32, i32
  }
}

</mosaic_0001>

<bundles_post_ra>
// kernel: tpu_custom_call.1
= control target key start
LH: loop header
LB: loop body
LE: loop exit
PB: predicated region body
PF: predicated region fallthrough
CT: control target
= control target key end

     0   :  { %7 = vsyncpa [#allocation3], 0  ;;  %s204_s0 = inlined_call_operand.hbm [shape: f32[16,32], index: 0, kind: input, shape index: {}]   ;;  %s205_s1 = inlined_call_operand.vmem [shape: f32[1,32], index: 1, kind: input, shape index: {}]   ;;  %s206_s2 = inlined_call_operand.hbm [shape: f32[16,32], index: 2, kind: output, shape index: {}]  }
   0x1   :  { %8 = vsyncpa [#allocation4], 0  ;;  %s148_s9 = smov [#allocation2]   ;;  %s100_s13 = scalar_lea.hbm %s204_s0, 256 }
   0x2   :  { %s14_s10 = sshll.u32 %s148_s9, 4  ;;  %p101_p0 = scmp.ne.s32.totalorder %s204_s0, %s100_s13  ;;  %s15_s10 = int_to_ptr.vmem [resolvable:$true] %s14_s10 }
   0x3   :  { %p104_p1 = scmp.lt.u32.totalorder %s100_s13, %s204_s0 }
   0x5   :  { %p106_p2 = pnand %p104_p1, %p101_p0 }
   0x7   :  { %109 = shalt.err (!%p106_p2)
}
   0x8   :  { %s110_s18 = scalar_lea.vmem %s15_s10, 256  ;;  %p115_p4 = scmp.lt.s32.totalorder %s15_s10, %s15_s10 }
   0x9   :  { %p111_p3 = scmp.ne.s32.totalorder %s15_s10, %s110_s18  ;;  %p116_p5 = scmp.lt.s32.totalorder %s110_s18, %s110_s18 }
   0xb   :  { %p117_p6 = por %p116_p5, %p115_p4 }
   0xd   :  { %p118_p7 = pnand %p117_p6, %p111_p3 }
   0xf   :  { %121 = shalt.err (!%p118_p7)
}
  0x10   :  { %s149_s19 = smov 128   ;;  %s150_s20 = smov 8  }
  0x11   :  { %20 = dma.hbm_to_vmem [thread:$0]  %s204_s0, 256, %s15_s10, [#allocation3], %s149_s19, %s149_s19, %s150_s20  }
  0x12   :  { %144 = dma.done.wait [#allocation3], 256  }
  0x13   :  { %145 = vsyncadd [#allocation3], 4294967040  ;;  %v26_v0 = vld [vmem:[#allocation2] sm:$0xff]  ;;  %vm30_vm0 = vcmask 261120   ;;  %v27_v1 = vld [vmem:[#allocation2 + $0x8] sm:$0xff]  ;;  %s151_s24 = smov [#allocation5]  }
  0x14   :  { %v28_v2 = vmul.f32 %v26_v0, %v26_v0  ;;  %v29_v3 = vmul.f32 %v27_v1, %v27_v1  ;;  %v87_v22 = vld [vmem:[%s205_s1] ss:$0 sm:$0xff]  ;;  %s75_s25 = sshll.u32 %s151_s24, 4  ;;  %s76_s25 = int_to_ptr.vmem [resolvable:$true] %s75_s25 }
  0x15   :  { %s122_s26 = scalar_lea.vmem %s76_s25, 256  ;;  %p127_p9 = scmp.lt.s32.totalorder %s76_s25, %s76_s25 }
  0x16   :  { %v31_v4 = vsel %vm30_vm0, %v28_v2, 0.0  ;;  %v34_v5 = vsel %vm30_vm0, %v29_v3, 0.0  ;;  %p123_p8 = scmp.ne.s32.totalorder %s76_s25, %s122_s26  ;;  %p128_p10 = scmp.lt.s32.totalorder %s122_s26, %s122_s26 }
  0x17   :  { %32 = vadd.xlane.f32.xlu0 %v31_v4 }
  0x18   :  { %p129_p11 = por %p128_p10, %p127_p9 }
  0x1a   :  { %p130_p12 = pnand %p129_p11, %p123_p8 }
  0x1b   :  { %35 = vadd.xlane.f32.xlu0 %v34_v5 }
  0xa4   :  { %v33_v6 = vpop.xlane.xlu0 %32 }
  0xa5   :  { %92 = vrsqrt.f32 %v33_v6  ;;  %vm39_vm1 = vcmp.eq.f32.partialorder %v33_v6, inf  ;;  %v42_v10 = vand.u32 2147483648, %v33_v6  ;;  %vm41_vm2 = vcmp.eq.f32.partialorder %v33_v6, 0.0 }
  0xa8   :  { %v36_v7 = vpop.xlane.xlu0 %35 }
  0xa9   :  { %94 = vrsqrt.f32 %v36_v7  ;;  %vm46_vm3 = vcmp.eq.f32.partialorder %v36_v7, inf  ;;  %v49_v16 = vand.u32 2147483648, %v36_v7  ;;  %vm48_vm4 = vcmp.eq.f32.partialorder %v36_v7, 0.0 }
  0xaf   :  { %v93_v8 = vpop.eup %92 }
  0xb0   :  { %v38_v9 = vmul.f32 %v93_v8, %v33_v6 }
  0xb2   :  { %v40_v11 = vsel %vm39_vm1, %v33_v6, %v38_v9 }
  0xb3   :  { %v95_v12 = vpop.eup %94  ;;  %v43_v13 = vsel %vm41_vm2, %v42_v10, %v40_v11 }
  0xb4   :  { %v51_v14 = vmul.f32 0.17677669, %v43_v13  ;;  %v45_v15 = vmul.f32 %v95_v12, %v36_v7 }
  0xb6   :  { %v53_v17 = vadd.f32 1e-08, %v51_v14  ;;  %v47_v18 = vsel %vm46_vm3, %v36_v7, %v45_v15 }
  0xb7   :  { %v50_v19 = vsel %vm48_vm4, %v49_v16, %v47_v18 }
  0xb8   :  { %96 = vrcp.f32 %v53_v17  ;;  %v52_v20 = vmul.f32 0.17677669, %v50_v19 }
  0xba   :  { %v54_v21 = vadd.f32 1e-08, %v52_v20 }
  0xbc   :  { %98 = vrcp.f32 %v54_v21 }
  0xc2   :  { %v97_v23 = vpop.eup %96 }
  0xc3   :  { %v64_v24 = vmul.f32 %v97_v23, %v87_v22 }
  0xc5   :  { %v66_v25 = vmul.f32 %v64_v24, %v26_v0 }
  0xc6   :  { %v99_v26 = vpop.eup %98 }
  0xc7   :  { %v65_v27 = vmul.f32 %v99_v26, %v87_v22  ;;  %68 = vst.msk [vmem:[#allocation5] sm:$0xff] %vm30_vm0, %v66_v25 }
  0xc9   :  { %v67_v28 = vmul.f32 %v65_v27, %v27_v1 }
  0xcb   :  { %69 = vst.msk [vmem:[#allocation5 + $0x8] sm:$0xff] %vm30_vm0, %v67_v28 }
  0xcc   :  { %133 = shalt.err (!%p130_p12)
}
  0xcd   :  { %s134_s28 = scalar_lea.hbm %s206_s2, 256 }
  0xce   :  { %p135_p13 = scmp.ne.s32.totalorder %s206_s2, %s134_s28  ;;  %p138_p0 = scmp.lt.u32.totalorder %s134_s28, %s206_s2 }
  0xd0   :  { %p140_p1 = pnand %p138_p0, %p135_p13 }
  0xd2   :  { %143 = shalt.err (!%p140_p1)
}
  0xd3   :  { %81 = dma.vmem_to_hbm [thread:$0]  %s76_s25, 256, %s206_s2, [#allocation4], %s149_s19, %s149_s19, %s150_s20  }
  0xd4   :  { %146 = dma.done.wait [#allocation4], 256  }
  0xd5   :  { %147 = vsyncadd [#allocation4], 4294967040 }
  0xd6   :  { %85 = vsyncpa [#allocation3], 1 }
  0xd7   :  { %86 = vsyncpa [#allocation4], 1 }

</bundles_post_ra>
